<compile_context>
chip_gen: v5e
topology: v5e:2x2
jax: 0.10.0
libtpu: 0.0.40
codegen_flags: <defaults>
</compile_context>

<pallas_src>
import jax
import jax.numpy as jnp
from jax import lax
from jax.experimental import pallas as pl
from jax.experimental.pallas import tpu as pltpu


def _round_up(x, m):
    return ((x + m - 1) // m) * m


def _decoder_linear_kernel(x_ref, w_ref, b_ref, o_ref):
    # x_ref : (1, TN, D)      token tile (any float dtype; cast to bf16 here)
    # w_ref : (C_pad, D)      head weight (bf16), resident across grid steps
    # b_ref : (C_pad, 1)      head bias (f32), resident across grid steps
    # o_ref : (1, C_pad, TN)  transposed logits tile (lane-dense along TN)
    x = x_ref[0].astype(jnp.bfloat16)       # (TN, D)
    w = w_ref[...]                          # (C_pad, D) bf16
    # y^T = W @ x^T  (contract D on both operands) -> (C_pad, TN), f32 accum.
    yt = lax.dot_general(
        w, x,
        dimension_numbers=(((1,), (1,)), ((), ())),
        preferred_element_type=jnp.float32,
    )
    yt = yt + b_ref[...]                    # broadcast (C_pad, 1) over lanes
    o_ref[0] = yt.astype(o_ref.dtype)


def decoder_linear_head(x, w, bias, *, tile_n=512):
    """Linear head, transposed output.

    x    : (B, N, D)      tokens
    w    : (C_pad, D)     weight (bf16), rows >= n_cls are zero padding
    bias : (C_pad, 1)     bias (f32)
    returns (B, C_pad, N) float32 logits (class dim on sublanes, tokens on lanes)
    """
    B, N, D = x.shape
    C_pad = w.shape[0]
    # Token-tile size: full N if small, else a 128-aligned tile (multiple of 8).
    TN = N if N <= tile_n else tile_n
    grid = (B, pl.cdiv(N, TN))
    return pl.pallas_call(
        _decoder_linear_kernel,
        out_shape=jax.ShapeDtypeStruct((B, C_pad, N), jnp.float32),
        grid_spec=pltpu.PrefetchScalarGridSpec(
            num_scalar_prefetch=0,
            grid=grid,
            in_specs=[
                pl.BlockSpec((1, TN, D), lambda b, j: (b, j, 0)),
                pl.BlockSpec((C_pad, D), lambda b, j: (0, 0)),   # resident
                pl.BlockSpec((C_pad, 1), lambda b, j: (0, 0)),   # resident
            ],
            out_specs=pl.BlockSpec((1, C_pad, TN), lambda b, j: (b, 0, j)),
        ),
        compiler_params=pltpu.CompilerParams(
            dimension_semantics=("parallel", "parallel"),
        ),
    )(x, w, bias)


class DecoderLinearPallas:
    """JAX/Pallas equivalent of segmenter_model.decoder.DecoderLinear."""

    def __init__(self, n_cls, patch_size, d_encoder, key, tile_n=512):
        self.n_cls = n_cls
        self.patch_size = patch_size
        self.d_encoder = d_encoder
        self.tile_n = tile_n
        self.n_cls_pad = _round_up(n_cls, 8)

        kw, _ = jax.random.split(key)
        # Deterministic trunc_normal-like init; in practice load real weights.
        w = 0.02 * jax.random.truncated_normal(
            kw, -2.0, 2.0, (n_cls, d_encoder), dtype=jnp.float32
        )
        w_pad = jnp.zeros((self.n_cls_pad, d_encoder), jnp.float32)
        w_pad = w_pad.at[:n_cls].set(w)
        self.w = w_pad.astype(jnp.bfloat16)                 # (C_pad, D) bf16
        self.bias = jnp.zeros((self.n_cls_pad, 1), jnp.float32)  # (C_pad, 1)

    def __call__(self, x, im_size):
        # x: (B, N, D);  im_size = (H, W) in pixels
        H_img, W_img = im_size
        GS = H_img // self.patch_size        # grid height in tokens
        B, N, D = x.shape
        WS = N // GS                         # grid width in tokens
        y = decoder_linear_head(x, self.w, self.bias, tile_n=self.tile_n)
        # y: (B, C_pad, N).  Drop class padding, then the 'b (h w) c -> b c h w'
        # rearrange collapses to a free reshape of the last dim.
        if self.n_cls_pad != self.n_cls:
            y = y[:, : self.n_cls, :]
        return y.reshape(B, self.n_cls, GS, WS)


if __name__ == "__main__":
    key = jax.random.PRNGKey(0)
    k_x, k_p = jax.random.split(key)

    # Small shapes: batch=2, d_encoder=32, n_cls=8, patch_size=4, image 16x16
    B, d_encoder, n_cls, patch_size = 2, 32, 8, 4
    H_img = W_img = 16
    GS = H_img // patch_size
    WS = W_img // patch_size
    N = GS * WS                              # 16 tokens

    x = jax.random.normal(k_x, (B, N, d_encoder), dtype=jnp.float32)

    decoder = DecoderLinearPallas(n_cls, patch_size, d_encoder, k_p)
    out = decoder(x, (H_img, W_img))
    out = jax.block_until_ready(out)

    # Reference in the same precision regime (bf16 inputs, f32 accumulate).
    x_bf = x.astype(jnp.bfloat16).astype(jnp.float32)
    w_f = decoder.w[:n_cls].astype(jnp.float32)              # (C, D)
    b_f = decoder.bias[:n_cls, 0]                            # (C,)
    ref = jnp.einsum(
        "bnd,cd->bcn", x_bf, w_f, precision=jax.lax.Precision.HIGHEST
    ) + b_f[None, :, None]
    ref = ref.reshape(B, n_cls, GS, WS)

    assert out.shape == (B, n_cls, GS, WS)
    assert jnp.allclose(out, ref, atol=1e-3, rtol=1e-3), float(
        jnp.max(jnp.abs(out - ref))
    )

    print("KERNEL_OK")
</pallas_src>

<mosaic_0001>
module attributes {stable_mosaic.version = 11 : i64} {
  func.func @_decoder_linear_kernel(%arg0: i32, %arg1: i32, %arg2: memref<1x16x32xf32, #tpu.memory_space<vmem>>, %arg3: memref<8x32xbf16, #tpu.memory_space<vmem>>, %arg4: memref<8x1xf32, #tpu.memory_space<vmem>>, %arg5: memref<1x8x16xf32, #tpu.memory_space<vmem>>) attributes {dimension_semantics = [#tpu.dimension_semantics<parallel>, #tpu.dimension_semantics<parallel>], iteration_bounds = array<i64: 2, 1>, scalar_prefetch = 0 : i64, scratch_operands = 0 : i64, tpu.core_type = #tpu.core_type<tc>, window_params = [{transform_indices = @transform_0, window_bounds = array<i64: 1, 16, 32>}, {pipeline_mode = #tpu.pipeline_mode<synchronous>, transform_indices = @transform_1, window_bounds = array<i64: 8, 32>}, {pipeline_mode = #tpu.pipeline_mode<synchronous>, transform_indices = @transform_2, window_bounds = array<i64: 8, 1>}, {transform_indices = @transform_3, window_bounds = array<i64: 1, 8, 16>}]} {
    %c0 = arith.constant 0 : index
    %c0_0 = arith.constant 0 : index
    %c0_1 = arith.constant 0 : index
    %0 = vector.load %arg2[%c0, %c0_0, %c0_1] : memref<1x16x32xf32, #tpu.memory_space<vmem>>, vector<1x16x32xf32>
    %1 = vector.shape_cast %0 : vector<1x16x32xf32> to vector<16x32xf32>
    %2 = arith.truncf %1 : vector<16x32xf32> to vector<16x32xbf16>
    %c0_2 = arith.constant 0 : index
    %c0_3 = arith.constant 0 : index
    %3 = vector.load %arg3[%c0_2, %c0_3] : memref<8x32xbf16, #tpu.memory_space<vmem>>, vector<8x32xbf16>
    %cst = arith.constant dense<0.000000e+00> : vector<8x16xf32>
    %4 = tpu.matmul %3, %2, %cst {dimension_numbers = #tpu.dot_dimension_numbers<[1], [1], [0], [0], [0, 0, 1, 0], [], []>} : vector<8x32xbf16>, vector<16x32xbf16>, vector<8x16xf32> -> vector<8x16xf32>
    %c0_4 = arith.constant 0 : index
    %c0_5 = arith.constant 0 : index
    %5 = vector.load %arg4[%c0_4, %c0_5] : memref<8x1xf32, #tpu.memory_space<vmem>>, vector<8x1xf32>
    %6 = vector.broadcast %5 : vector<8x1xf32> to vector<8x16xf32>
    %7 = arith.addf %4, %6 : vector<8x16xf32>
    %c0_6 = arith.constant 0 : index
    %c0_7 = arith.constant 0 : index
    %c0_8 = arith.constant 0 : index
    %8 = vector.load %arg5[%c0_6, %c0_7, %c0_8] : memref<1x8x16xf32, #tpu.memory_space<vmem>>, vector<1x8x16xf32>
    %9 = vector.shape_cast %8 : vector<1x8x16xf32> to vector<8x16xf32>
    %10 = vector.shape_cast %7 : vector<8x16xf32> to vector<1x8x16xf32>
    tpu.vector_store %arg5[%c0_6, %c0_7, %c0_8], %10 {strides = array<i32>} : memref<1x8x16xf32, #tpu.memory_space<vmem>>, vector<1x8x16xf32>,
    return
  }
  func.func @transform_0(%arg0: i32, %arg1: i32) -> (i32, i32, i32) {
    %c0_i32 = arith.constant 0 : i32
    %c0_i32_0 = arith.constant 0 : i32
    return %arg0, %arg1, %c0_i32 : i32, i32, i32
  }
  func.func @transform_1(%arg0: i32, %arg1: i32) -> (i32, i32) {
    %c0_i32 = arith.constant 0 : i32
    %c0_i32_0 = arith.constant 0 : i32
    %c0_i32_1 = arith.constant 0 : i32
    return %c0_i32, %c0_i32_0 : i32, i32
  }
  func.func @transform_2(%arg0: i32, %arg1: i32) -> (i32, i32) {
    %c0_i32 = arith.constant 0 : i32
    %c0_i32_0 = arith.constant 0 : i32
    %c0_i32_1 = arith.constant 0 : i32
    return %c0_i32, %c0_i32_0 : i32, i32
  }
  func.func @transform_3(%arg0: i32, %arg1: i32) -> (i32, i32, i32) {
    %c0_i32 = arith.constant 0 : i32
    %c0_i32_0 = arith.constant 0 : i32
    return %arg0, %c0_i32, %arg1 : i32, i32, i32
  }
}

</mosaic_0001>

<bundles_post_ra>
// kernel: tpu_custom_call.1
= control target key start
LH: loop header
LB: loop body
LE: loop exit
PB: predicated region body
PF: predicated region fallthrough
CT: control target
= control target key end

     0   :  { %8 = vsyncpa [#allocation3], 0  ;;  %s688_s0 = inlined_call_operand.hbm [shape: f32[2,16,32], index: 0, kind: input, shape index: {}]   ;;  %s689_s1 = inlined_call_operand.vmem [shape: bf16[8,32], index: 1, kind: input, shape index: {}]   ;;  %s690_s2 = inlined_call_operand.vmem [shape: f32[8,1], index: 2, kind: input, shape index: {}]   ;;  %s691_s3 = inlined_call_operand.hbm [shape: f32[2,8,16], index: 3, kind: output, shape index: {}]  }
   0x1   :  { %10 = vsyncpa [#allocation3 + $0x1], 0 }
   0x2   :  { %11 = vsyncpa [#allocation4], 0 }
   0x3   :  { %13 = vsyncpa [#allocation4 + $0x1], 0  ;;  %s561_s12 = smov 0   ;;  %s563_s13 = smov 0  }
   0x4   :  { %s565_s14 = smov 0   ;;  %s567_s15 = smov 0  }
   0x5   :  { %s569_s16 = smov 0   ;;  %s571_s17 = smov 0  }
   0x6 LB: > { %s342_s18 = sadd.s32 4294967295, %s536_s17   ;;  %s343_s19 = sadd.s32 4294967294, %s536_s17   ;;  %s536_s17 = sphi %s571_s17, %s19_s17   ;;  %s532_s16 = sphi %s569_s16, %s700_s16   ;;  %s528_s15 = sphi %s567_s15, %s699_s15   ;;  %s524_s14 = sphi %s565_s14, %s698_s14   ;;  %s520_s13 = sphi %s563_s13, %s697_s13   ;;  %s516_s12 = sphi %s561_s12, %s696_s12  }
   0x7   : > { %s31_s20 = sadd.s32 1, %s532_s16  ;;  %s40_s21 = sadd.s32 1, %s524_s14 }
   0x8   : > { %p33_p0 = scmp.ge.s32.totalorder %s31_s20, 2  ;;  %p47_p1 = scmp.ne.s32.totalorder %s524_s14, %s520_s13 }
   0x9   : > { %p48_p2 = scmp.eq.s32.totalorder %s536_s17, 0  ;;  %p53_p3 = scmp.ne.s32.totalorder %s520_s13, %s516_s12 }
   0xa   : > { %s702_s20 = smov (%p33_p0, %s31_s20), 0  ;;  %p54_p5 = scmp.eq.s32.totalorder %s342_s18, 0 }
   0xb   : > { %p602_p4 = por %p48_p2, %p47_p1  ;;  %s35_s23 = ssub.s32 %s532_s16, %s702_s20 }
   0xc   : > { %p121_p6 = scmp.eq.s32.totalorder %s342_s18, 1  ;;  %p38_p7 = scmp.eq.s32.totalorder %s35_s23, 0 }
   0xd   : > { %p608_p8 = por %p54_p5, %p53_p3  ;;  %p127_p10 = scmp.eq.s32.totalorder %s343_s19, 1 }
   0xe   : > { %p612_p9 = por %p121_p6, %p47_p1  ;;  %p345_p12 = scmp.ge.s32.totalorder %s536_s17, 2 }
   0xf   : > { %s617_s26 = scalar_select %p38_p7, %s524_s14, %s40_s21  }
  0x10   : > { %p619_p11 = por %p127_p10, %p53_p3  ;;  %p370_p13 = scmp.lt.s32.totalorder %s536_s17, 2 }
  0x11   : > { %s153_s28 = sand.u32 1, %s524_s14   ;;  %s357_s30 = sshll.u32 %s532_s16, 4 }
  0x12   : > { %s346_s29 = sshll.u32 %s153_s28, 4  ;;  %s164_s6 = scalar_lea.hbm %s688_s0, %s357_s30 }
  0x13   : > { %s157_s7 = scalar_lea.vmem [#allocation2], %s346_s29  ;;  %s165_s9 = sshll.u32 %s164_s6, 4  ;;  %s166_s9 = int_to_ptr.hbm [resolvable:$true] %s165_s9 }
  0x14   : > { %s167_s8 = sshll.u32 %s157_s7, 4  ;;  %p363_p0 = pnand %p370_p13, %p602_p4  ;;  %s168_s8 = int_to_ptr.vmem [resolvable:$true] %s167_s8 }
  0x15   : > { %p349_p1 = scmp.ge.s32.totalorder %s536_s17, 1  ;;  %s154_s10 = scalar_lea.sflag [#allocation3], %s153_s28 }
  0x16   : > { %s538_s11 = smov 128   ;;  %s539_s18 = smov 8  }
  0x17   : > { %365 = dma.hbm_to_vmem [thread:$0]  (!%p363_p0), %s166_s9, 256, %s168_s8, %s154_s10, %s538_s11, %s538_s11, %s539_s18  }
  0x18   : > { %p175_p2 = scmp.lt.s32.totalorder %s536_s17, 3 }
  0x1a   : > { %p176_p3 = pnand %p349_p1, %p175_p2 }
  0x1b   : > { %s635_s19 = sand.u32 (!%p176_p3), 1, %s520_s13  }
  0x1c   : > { %179 = sbr.rel (%p176_p3) target bundleno = 179 (0xb3), region = 32  ;;  %s350_s21 = sshll.u32 (!%p176_p3), %s635_s19, 4 }
  0x1d   : > { %s182_s23 = scalar_lea.sflag (!%p176_p3), [#allocation3], %s635_s19  ;;  %s185_s29 = scalar_lea.vmem (!%p176_p3), [#allocation2], %s350_s21 }
  0x21   : > { %507 = dma.done.wait (%p608_p8), %s182_s23, 256  }
  0x22   : > { %509 = vsyncadd (%p608_p8), %s182_s23, 4294967040  ;;  %v540_v0 = vmov 0   ;;  %v211_v1 = vld [vmem:[%s185_s29] sm:$0xff]  ;;  %v212_v2 = vld [vmem:[%s185_s29 + $0x8] sm:$0xff]  ;;  %vm221_vm0 = vcmask 261120   ;;  %s354_s24 = sshll.u32 %s528_s15, 3 }
  0x23   : > { %423 = vset.pattern.permute.xlu0 %v540_v0  ;;  %v213_v3 = vpack.c.bf16 %v212_v2, %v211_v1  ;;  %v215_v4 = vld [vmem:[%s690_s2] sm:$0xff]  ;;  %s351_s5 = sshll.u32 %s635_s19, 3  ;;  %s255_s8 = scalar_lea.hbm %s691_s3, %s354_s24  ;;  %vm241_vm1 = vcmask 130048  }
  0x24   : > { %218 = vperm.xlu0 %423, %v215_v4   ;;  %v214_v6 = vld [vmem:[%s689_s1] sm:$0xf]  ;;  %s208_s9 = scalar_lea.vmem [#allocation5], %s351_s5  ;;  %s259_s11 = sshll.u32 %s255_s8, 4  ;;  %s260_s11 = int_to_ptr.hbm [resolvable:$true] %s259_s11 }
  0x25   : > { %v226_v5 = vsel %vm221_vm0, %v213_v3, 0  ;;  %s257_s10 = sshll.u32 %s208_s9, 4  ;;  %s244_s18 = scalar_lea.sflag [#allocation4], %s635_s19  ;;  %s258_s10 = int_to_ptr.vmem [resolvable:$true] %s257_s10 }
  0x26   : > { %235 = vmatpush.bf16.xpose.msra.mxu0 %v226_v5  ;;  %s468_s21 = sshra.s32 %s260_s11, 4  ;;  %s474_s22 = scalar_lea.hbm %s691_s3, 16  ;;  %s469_s21 = int_to_ptr.hbm [resolvable:$true] %s468_s21 }
  0x27   : > { %s470_s15 = scalar_lea.hbm %s469_s21, 8  ;;  %p475_p7 = scmp.lt.s32.totalorder %s469_s21, %s691_s3 }
  0x28   : > { %p471_p4 = scmp.ne.s32.totalorder %s469_s21, %s470_s15  ;;  %p476_p8 = scmp.lt.s32.totalorder %s474_s22, %s470_s15 }
  0x2a   : > { %p472_p5 = pnand %p471_p4, %p612_p9  ;;  %p477_p10 = por %p476_p8, %p475_p7 }
  0x2c   : > { %p473_p6 = pneg %p472_p5 }
  0x2d   : > { %352 = vmatmul.msk.bf16.vlgmr.msra.gmra.mxu0 %vm221_vm0, %v214_v6 }
  0x2e   : > { %p478_p13 = pnand %p477_p10, %p473_p6 }
  0x96   : > { %v219_v7 = vpop.permute.xlu0 %218 }
  0xaa   : > { %v237_v8 = vpop.f32.mrf.mxu0 }
  0xab   : > { %v238_v9 = vadd.f32 %v237_v8, %v219_v7 }
  0xad   : > { %242 = vst.msk [vmem:[%s208_s9] sm:$0xff] %vm241_vm1, %v238_v9 }
  0xae   : > { %481 = shalt.err (!%p478_p13)
}
  0xaf   : > { %360 = dma.vmem_to_hbm [thread:$0]  (%p612_p9), %s258_s10, 128, %s260_s11, %s244_s18  }
  0xb2   : > { %v239_v10 = vpop.f32.mrf.mxu0 }
  0xb3 PF: > { %s271_s19 = sand.u32 1, %s516_s12   ;;  %p367_p0 = pnand %p345_p12, %p619_p11 }
  0xb4   : > { %s272_s4 = scalar_lea.sflag [#allocation4], %s271_s19 }
  0xb5   : > { %p368_p1 = pneg %p367_p0 }
  0xb7   : > { %511 = dma.done.wait (%p368_p1), %s272_s4, 128  }
  0xb8   : > { %513 = vsyncadd (%p368_p1), %s272_s4, 4294967168  ;;  %s19_s17 = sadd.s32 1, %s536_s17   ;;  %s696_s12 = smov %s520_s13 }
  0xb9   : > { %p16_p2 = scmp.ge.s32.totalorder %s19_s17, 4   ;;  %s697_s13 = smov %s524_s14 }
  0xba   : > { %s698_s14 = smov %s617_s26  ;;  %s699_s15 = smov %s532_s16 }
  0xbb   : > { %s700_s16 = smov %s702_s20  ;;  %18 = sbr.rel (!%p16_p2) target bundleno = 6 (0x6), region = 77 }
  0xc0   :  { %278 = vsyncpa [#allocation3], 1 }
  0xc1   :  { %280 = vsyncpa [#allocation3 + $0x1], 1 }
  0xc2   :  { %281 = vsyncpa [#allocation4], 1 }
  0xc3   :  { %283 = vsyncpa [#allocation4 + $0x1], 1 }

</bundles_post_ra>
